<compile_context>
chip_gen: v5e
topology: v5e:2x2
jax: 0.10.0
libtpu: 0.0.40
codegen_flags: <defaults>
</compile_context>

<pallas_src>
import jax
import jax.numpy as jnp
from jax.experimental import pallas as pl
from jax.experimental.pallas import tpu as pltpu


def _penalized_tanh_kernel(x_ref, o_ref):
    x = x_ref[...]
    # Compute in f32: EUP tanh, VALU max/mul/add. Store back in input dtype to
    # keep HBM write traffic minimal.
    t = jnp.tanh(x.astype(jnp.float32))
    out = 0.75 * jnp.maximum(t, 0.0) + 0.25 * t
    o_ref[...] = out.astype(o_ref.dtype)


def penalized_tanh(x):
    """Elementwise penalized tanh via a Pallas TPU kernel."""
    orig_shape = x.shape
    orig_dtype = x.dtype
    n = x.size

    x_flat = jnp.ravel(x)

    # Widest lane count (multiple of 128) that divides n -> no pad/slice pass.
    lane = None
    for c in (4096, 2048, 1024, 512, 256, 128):
        if n % c == 0:
            lane = c
            break

    if lane is None:
        # Ragged tail: pad minimally to a multiple of 128 lanes. Zero padding
        # is benign (tanh(0) = 0); the tail is sliced off afterwards.
        lane = 128
        rows = pl.cdiv(n, lane)
        x_flat = jnp.pad(x_flat, (0, rows * lane - n))
    else:
        rows = n // lane

    x2d = x_flat.reshape(rows, lane)

    # ~512K elements (~2 MiB f32) per block: mem-bound plateau, and small
    # enough that double-buffered in+out fits the scoped-VMEM default.
    target_rows = max(1, (512 * 1024) // lane)
    if rows <= target_rows:
        block_rows = rows                            # block == full dim (legal)
    else:
        block_rows = max(8, (target_rows // 8) * 8)  # sublane-aligned tile

    grid = (pl.cdiv(rows, block_rows),)

    bytes_per_elem = jnp.dtype(orig_dtype).itemsize
    padded_n = rows * lane
    cost = pl.CostEstimate(
        flops=5 * padded_n,
        transcendentals=padded_n,
        bytes_accessed=2 * padded_n * bytes_per_elem,
    )

    out2d = pl.pallas_call(
        _penalized_tanh_kernel,
        out_shape=jax.ShapeDtypeStruct((rows, lane), orig_dtype),
        grid_spec=pltpu.PrefetchScalarGridSpec(
            num_scalar_prefetch=0,
            grid=grid,
            in_specs=[pl.BlockSpec((block_rows, lane), lambda i: (i, 0))],
            out_specs=pl.BlockSpec((block_rows, lane), lambda i: (i, 0)),
        ),
        compiler_params=pltpu.CompilerParams(
            dimension_semantics=("parallel",),
            vmem_limit_bytes=32 * 1024 * 1024,
        ),
        cost_estimate=cost,
    )(x2d)

    out_flat = out2d.reshape(-1)
    if out_flat.size != n:
        out_flat = out_flat[:n]
    return out_flat.reshape(orig_shape)


def penalized_tanh_ref(x):
    t = jnp.tanh(x.astype(jnp.float32))
    return (0.75 * jnp.maximum(t, 0.0) + 0.25 * t).astype(x.dtype)


if __name__ == "__main__":
    key = jax.random.PRNGKey(0)
    # PyTorch-style NCHW input (batch=2, channels=4, spatial=16x16).
    x = jax.random.normal(key, (2, 4, 16, 16), dtype=jnp.float32) * 2.0

    out = penalized_tanh(x)
    out = jax.block_until_ready(out)

    ref = penalized_tanh_ref(x)
    assert out.shape == x.shape
    assert out.dtype == x.dtype
    assert jnp.allclose(out, ref, atol=1e-6, rtol=1e-6), "mismatch vs reference"

    print("KERNEL_OK")
</pallas_src>

<mosaic_0001>
module attributes {stable_mosaic.version = 11 : i64} {
  func.func @_penalized_tanh_kernel(%arg0: i32, %arg1: memref<1x2048xf32, #tpu.memory_space<vmem>>, %arg2: memref<1x2048xf32, #tpu.memory_space<vmem>>) attributes {dimension_semantics = [#tpu.dimension_semantics<parallel>], iteration_bounds = array<i64: 1>, scalar_prefetch = 0 : i64, scratch_operands = 0 : i64, tpu.core_type = #tpu.core_type<tc>, window_params = [{transform_indices = @transform_0, window_bounds = array<i64: 1, 2048>}, {transform_indices = @transform_1, window_bounds = array<i64: 1, 2048>}]} {
    %c0 = arith.constant 0 : index
    %c0_0 = arith.constant 0 : index
    %0 = vector.load %arg1[%c0, %c0_0] : memref<1x2048xf32, #tpu.memory_space<vmem>>, vector<1x2048xf32>
    %1 = math.tanh %0 : vector<1x2048xf32>
    %cst = arith.constant 0.000000e+00 : f32
    %2 = vector.broadcast %cst : f32 to vector<1x2048xf32>
    %3 = arith.maximumf %1, %2 : vector<1x2048xf32>
    %cst_1 = arith.constant 7.500000e-01 : f32
    %4 = vector.broadcast %cst_1 : f32 to vector<1x2048xf32>
    %5 = arith.mulf %4, %3 : vector<1x2048xf32>
    %cst_2 = arith.constant 2.500000e-01 : f32
    %6 = vector.broadcast %cst_2 : f32 to vector<1x2048xf32>
    %7 = arith.mulf %6, %1 : vector<1x2048xf32>
    %8 = arith.addf %5, %7 : vector<1x2048xf32>
    %c0_3 = arith.constant 0 : index
    %c0_4 = arith.constant 0 : index
    %9 = vector.load %arg2[%c0_3, %c0_4] : memref<1x2048xf32, #tpu.memory_space<vmem>>, vector<1x2048xf32>
    tpu.vector_store %arg2[%c0_3, %c0_4], %8 {strides = array<i32>} : memref<1x2048xf32, #tpu.memory_space<vmem>>, vector<1x2048xf32>,
    return
  }
  func.func @transform_0(%arg0: i32) -> (i32, i32) {
    %c0_i32 = arith.constant 0 : i32
    %c0_i32_0 = arith.constant 0 : i32
    return %arg0, %c0_i32 : i32, i32
  }
  func.func @transform_1(%arg0: i32) -> (i32, i32) {
    %c0_i32 = arith.constant 0 : i32
    %c0_i32_0 = arith.constant 0 : i32
    return %arg0, %c0_i32 : i32, i32
  }
}

</mosaic_0001>

<bundles_post_ra>
// kernel: tpu_custom_call.1
= control target key start
LH: loop header
LB: loop body
LE: loop exit
PB: predicated region body
PF: predicated region fallthrough
CT: control target
= control target key end

     0   :  { %6 = vsyncpa [#allocation3], 0  ;;  %s130_s0 = inlined_call_operand.hbm [shape: f32[1,2048], index: 0, kind: input, shape index: {}]   ;;  %s131_s1 = inlined_call_operand.hbm [shape: f32[1,2048], index: 1, kind: output, shape index: {}]  }
   0x1   :  { %7 = vsyncpa [#allocation4], 0  ;;  %s13_s8 = sshll.u32 %s130_s0, 4  ;;  %s112_s9 = smov [#allocation2]   ;;  %s14_s8 = int_to_ptr.hbm [resolvable:$true] %s13_s8 }
   0x2   :  { %s15_s10 = sshll.u32 %s112_s9, 4  ;;  %s16_s10 = int_to_ptr.vmem [resolvable:$true] %s15_s10 }
   0x3   :  { %18 = dma.hbm_to_vmem [thread:$0]  %s14_s8, 256, %s16_s10, [#allocation3]  }
   0x4   :  { %108 = dma.done.wait [#allocation3], 256  }
   0x5   :  { %109 = vsyncadd [#allocation3], 4294967040  ;;  %v23_v0 = vld [vmem:[#allocation2] sm:$0xff]  ;;  %v24_v1 = vld [vmem:[#allocation2 + $0x8] sm:$0xff]  ;;  %s113_s11 = smov [#allocation5]   ;;  %s44_s14 = sshll.u32 %s131_s1, 4  ;;  %s45_s14 = int_to_ptr.hbm [resolvable:$true] %s44_s14 }
   0x6   :  { %56 = vtanh.f32 %v23_v0  ;;  %s42_s0 = sshll.u32 %s113_s11, 4  ;;  %s43_s0 = int_to_ptr.vmem [resolvable:$true] %s42_s0 }
   0x7   :  { %58 = vtanh.f32 %v24_v1 }
   0xc   :  { %v57_v2 = vpop.eup %56 }
   0xd   :  { %v59_v3 = vpop.eup %58  ;;  %v27_v4 = vmax.f32 %v57_v2, 0.0  ;;  %v31_v5 = vmul.f32 0.25, %v57_v2 }
   0xe   :  { %v28_v6 = vmax.f32 %v59_v3, 0.0  ;;  %v32_v7 = vmul.f32 0.25, %v59_v3 }
   0xf   :  { %v29_v8 = vmul.f32 0.75, %v27_v4 }
  0x10   :  { %v30_v9 = vmul.f32 0.75, %v28_v6 }
  0x11   :  { %v33_v10 = vadd.f32 %v31_v5, %v29_v8 }
  0x12   :  { %v34_v11 = vadd.f32 %v32_v7, %v30_v9 }
  0x13   :  { %35 = vst [vmem:[#allocation5] sm:$0xff] %v33_v10 }
  0x14   :  { %36 = vst [vmem:[#allocation5 + $0x8] sm:$0xff] %v34_v11 }
  0x15   :  { %47 = dma.vmem_to_hbm [thread:$0]  %s43_s0, 256, %s45_s14, [#allocation4]  }
  0x16   :  { %110 = dma.done.wait [#allocation4], 256  }
  0x17   :  { %111 = vsyncadd [#allocation4], 4294967040 }
  0x18   :  { %52 = vsyncpa [#allocation3], 1 }
  0x19   :  { %53 = vsyncpa [#allocation4], 1 }

</bundles_post_ra>
